<compile_context>
chip_gen: v6e
topology: v6e:2x2x1
jax: 0.10.0
libtpu: 0.0.40
codegen_flags: <defaults>
</compile_context>

<pallas_src>
import jax
import jax.numpy as jnp
import numpy as np
from jax import lax
from jax.experimental import pallas as pl
from jax.experimental.pallas import tpu as pltpu

_EPS_VAR = 1e-12  # rsqrt eps; stands in for the reference's (std + 1e-6) denominator


def _coupling_stack_kernel(x_ref, w1_ref, b1_ref, w2_ref, b2_ref,
                           w3_ref, b3_ref, z_ref, ld_ref):
    """Apply L chained AffineCoupling layers; whole batch resident in VMEM so
    each layer's ActNorm data-dependent-init statistics are exact."""
    num_layers = w1_ref.shape[0]
    x = x_ref[...].astype(jnp.float32)        # [B, 2]
    x_a = x[:, 0:1]                           # transformed half
    x_b = x[:, 1:2]                           # identity half (never modified)
    logdet = jnp.zeros_like(x_a)              # [B, 1]

    def actnorm_relu(h):
        # One-pass stats: E[h] and E[h*h] issue as back-to-back XLU sublane
        # reductions; var = E[h^2] - mean^2. rsqrt lowers to the EUP slot.
        mean = jnp.mean(h, axis=0, keepdims=True)
        mean_sq = jnp.mean(h * h, axis=0, keepdims=True)
        var = jnp.maximum(mean_sq - mean * mean, 0.0)
        inv_std = lax.rsqrt(var + _EPS_VAR)
        return jnp.maximum((h - mean) * inv_std, 0.0)

    # Static Python loop: num_layers is a trace-time constant, so every ref
    # index below is static (cheapest addressing; small L keeps vregs bounded).
    for l in range(num_layers):
        # fc1: [B,1] @ [1,W] is a K=1 contraction -> pure VPU broadcast outer
        # product (no MXU push/pop for a single contraction row).
        h = x_b * w1_ref[l] + b1_ref[l]                          # [B, W]
        h = actnorm_relu(h)

        # fc2: the only real matmul -> MXU with bf16 operands, f32 accumulation.
        h = jnp.dot(h.astype(jnp.bfloat16), w2_ref[l],
                    preferred_element_type=jnp.float32) + b2_ref[l]
        h = actnorm_relu(h)

        # fc3 ([B,W]@[W,2]) off the MXU: VPU multiplies against the pre-scaled
        # w3 rows + lane (axis=-1) reductions; overlaps the EUP sigmoid instead
        # of paying a second MXU fill/drain for 2 output columns.
        w3 = w3_ref[l]                                           # [2, W]
        b3 = b3_ref[l]                                           # [1, 2]
        t = jnp.sum(h * w3[0:1, :], axis=-1, keepdims=True) + b3[:, 0:1]
        s = jax.nn.sigmoid(jnp.sum(h * w3[1:2, :], axis=-1, keepdims=True)
                           + b3[:, 1:2])                         # "+2" folded into b3

        x_a = s * x_a + t
        logdet = logdet + jnp.log(s)

    # Narrow (lane-width-1) stores are a single masked vst at this size; a
    # lane-dense packed output only pays off at much larger batch.
    z_ref[:, 0:1] = x_a.astype(z_ref.dtype)
    z_ref[:, 1:2] = x_b.astype(z_ref.dtype)
    ld_ref[...] = logdet


def affine_coupling_stack_forward(x, stacked_params):
    """x: [B, 2] float32. stacked_params: per-layer params with a leading layer
    axis. Applies all layers in sequence inside ONE pallas_call.
    Returns (z [B, 2], logdet [B]) — logdet summed over the fused layers."""
    w1, b1, w2, b2, w3, b3, lsf = stacked_params
    num_layers, _, width = w1.shape
    B, dim = x.shape
    assert dim == 2, "kernel is specialized to the module default dim == 2"

    # Trace-time constant folding (constants w.r.t. x):
    #   exp(log_scale_factor) into fc3 rows/bias, the sigmoid's +2.0 into the
    #   s-column bias, fc2 pre-cast to bf16 for the MXU fast path.
    sf = jnp.exp(lsf.astype(jnp.float32))                         # [L, 1, 2]
    w3_rows = jnp.swapaxes(w3.astype(jnp.float32) * sf, 1, 2)     # [L, 2, W]
    b3_eff = b3.astype(jnp.float32) * sf + jnp.array([[0.0, 2.0]], jnp.float32)
    w2_bf16 = w2.astype(jnp.bfloat16)                             # [L, W, W]

    vmem = pl.BlockSpec(memory_space=pltpu.MemorySpace.VMEM)

    bytes_accessed = (x.size * 4 + w1.size * 4 + b1.size * 4 + w2.size * 2
                      + b2.size * 4 + w3_rows.size * 4 + b3_eff.size * 4
                      + x.size * 4 + B * 4)
    cost = pl.CostEstimate(
        flops=num_layers * (2 * B * width * width + 6 * B * width + 16 * B * width),
        transcendentals=num_layers * (2 * width + 2 * B),  # rsqrt per feature, sigmoid/log per row
        bytes_accessed=int(bytes_accessed),
    )

    z, logdet = pl.pallas_call(
        _coupling_stack_kernel,
        out_shape=(
            jax.ShapeDtypeStruct((B, dim), x.dtype),
            jax.ShapeDtypeStruct((B, 1), jnp.float32),
        ),
        in_specs=[vmem] * 7,
        out_specs=(vmem, vmem),
        cost_estimate=cost,
    )(x, w1, b1, w2_bf16, b2, w3_rows, b3_eff)
    return z, logdet[:, 0]


def _reference_layer(x, layer_params):
    """Pure-JAX f32 mirror of AffineCoupling.forward on a fresh module
    (ActNorm data-dependent init, unbiased=False std + 1e-6)."""
    w1, b1, w2, b2, w3, b3, lsf = layer_params
    x_a, x_b = x[:, 0:1], x[:, 1:2]

    def actnorm(h):
        mu = jnp.mean(h, axis=0, keepdims=True)
        std = jnp.sqrt(jnp.mean((h - mu) ** 2, axis=0, keepdims=True)) + 1e-6
        return (h - mu) / std

    h = jax.nn.relu(actnorm(x_b @ w1 + b1))
    h = jax.nn.relu(actnorm(h @ w2 + b2))
    h = (h @ w3 + b3) * jnp.exp(lsf)
    t, s = h[:, 0:1], jax.nn.sigmoid(h[:, 1:2] + 2.0)
    z = jnp.concatenate([s * x_a + t, x_b], axis=1)
    return z, jnp.sum(jnp.log(s), axis=1)


def _reference_stack(x, stacked_params):
    num_layers = stacked_params[0].shape[0]
    z = x
    logdet = jnp.zeros((x.shape[0],), jnp.float32)
    for l in range(num_layers):
        z, ld = _reference_layer(z, tuple(p[l] for p in stacked_params))
        logdet = logdet + ld
    return z, logdet


def make_stacked_params(key, num_layers, dim=2, width=128):
    """Deterministic synthetic parameters with a leading layer axis (shapes from
    AffineCoupling.__init__). Weights are stored [in, out] (equivalent to
    torch's [out, in] with x @ W.T). fc3 is given small nonzero values (the
    PyTorch __init__ zeroes it) so the whole pipeline is exercised."""
    keys = jax.random.split(key, 7)
    half = dim // 2
    w1 = jax.random.normal(keys[0], (num_layers, half, width), jnp.float32) * 0.5
    b1 = jax.random.normal(keys[1], (num_layers, 1, width), jnp.float32) * 0.1
    w2 = jax.random.normal(keys[2], (num_layers, width, width), jnp.float32) / np.sqrt(width)
    b2 = jax.random.normal(keys[3], (num_layers, 1, width), jnp.float32) * 0.1
    w3 = jax.random.normal(keys[4], (num_layers, width, dim), jnp.float32) * 0.05
    b3 = jax.random.normal(keys[5], (num_layers, 1, dim), jnp.float32) * 0.05
    lsf = jax.random.normal(keys[6], (num_layers, 1, 2), jnp.float32) * 0.1
    return (w1, b1, w2, b2, w3, b3, lsf)


if __name__ == "__main__":
    key = jax.random.PRNGKey(0)
    kx, kp = jax.random.split(key)

    B, DIM, WIDTH, LAYERS = 16, 2, 128, 4   # B multiple of 8 keeps sublanes unmasked
    x = jax.random.normal(kx, (B, DIM), jnp.float32)
    params = make_stacked_params(kp, LAYERS, dim=DIM, width=WIDTH)

    # (1) Single layer == exactly the original AffineCoupling module forward.
    params_1 = tuple(p[:1] for p in params)
    z1_ref, ld1_ref = _reference_stack(x, params_1)
    z1, ld1 = affine_coupling_stack_forward(x, params_1)
    jax.block_until_ready((z1, ld1))
    np.testing.assert_allclose(np.asarray(z1), np.asarray(z1_ref), rtol=2e-2, atol=2e-2)
    np.testing.assert_allclose(np.asarray(ld1), np.asarray(ld1_ref), rtol=2e-2, atol=2e-2)

    # (2) LAYERS chained couplings fused into one pallas_call (overhead amortization).
    z_ref, ld_ref = _reference_stack(x, params)
    z, ld = affine_coupling_stack_forward(x, params)
    jax.block_until_ready((z, ld))
    np.testing.assert_allclose(np.asarray(z), np.asarray(z_ref), rtol=2e-2, atol=2e-2)
    np.testing.assert_allclose(np.asarray(ld), np.asarray(ld_ref), rtol=2e-2, atol=2e-2)

    print("KERNEL_OK")
</pallas_src>

<mosaic_0001>
module attributes {stable_mosaic.version = 11 : i64} {
  func.func @_coupling_stack_kernel(%arg0: memref<16x2xf32, #tpu.memory_space<vmem>>, %arg1: memref<1x1x128xf32, #tpu.memory_space<vmem>>, %arg2: memref<1x1x128xf32, #tpu.memory_space<vmem>>, %arg3: memref<1x128x128xbf16, #tpu.memory_space<vmem>>, %arg4: memref<1x1x128xf32, #tpu.memory_space<vmem>>, %arg5: memref<1x2x128xf32, #tpu.memory_space<vmem>>, %arg6: memref<1x1x2xf32, #tpu.memory_space<vmem>>, %arg7: memref<16x2xf32, #tpu.memory_space<vmem>>, %arg8: memref<16x1xf32, #tpu.memory_space<vmem>>) attributes {dimension_semantics = [], scalar_prefetch = 0 : i64, scratch_operands = 0 : i64, tpu.core_type = #tpu.core_type<tc>} {
    %c0 = arith.constant 0 : index
    %c0_0 = arith.constant 0 : index
    %0 = vector.load %arg0[%c0, %c0_0] : memref<16x2xf32, #tpu.memory_space<vmem>>, vector<16x2xf32>
    %1 = vector.extract_strided_slice %0 {offsets = [0, 0], sizes = [16, 1], strides = [1, 1]} : vector<16x2xf32> to vector<16x1xf32>
    %2 = vector.extract_strided_slice %0 {offsets = [0, 1], sizes = [16, 1], strides = [1, 1]} : vector<16x2xf32> to vector<16x1xf32>
    %cst = arith.constant 0.000000e+00 : f32
    %3 = vector.broadcast %cst : f32 to vector<16x1xf32>
    %c0_1 = arith.constant 0 : index
    %c0_2 = arith.constant 0 : index
    %c0_3 = arith.constant 0 : index
    %4 = vector.load %arg1[%c0_1, %c0_2, %c0_3] : memref<1x1x128xf32, #tpu.memory_space<vmem>>, vector<1x1x128xf32>
    %5 = vector.shape_cast %4 : vector<1x1x128xf32> to vector<1x128xf32>
    %6 = vector.broadcast %2 : vector<16x1xf32> to vector<16x128xf32>
    %7 = vector.broadcast %5 : vector<1x128xf32> to vector<16x128xf32>
    %8 = arith.mulf %6, %7 : vector<16x128xf32>
    %c0_4 = arith.constant 0 : index
    %c0_5 = arith.constant 0 : index
    %c0_6 = arith.constant 0 : index
    %9 = vector.load %arg2[%c0_4, %c0_5, %c0_6] : memref<1x1x128xf32, #tpu.memory_space<vmem>>, vector<1x1x128xf32>
    %10 = vector.shape_cast %9 : vector<1x1x128xf32> to vector<1x128xf32>
    %11 = vector.broadcast %10 : vector<1x128xf32> to vector<16x128xf32>
    %12 = arith.addf %8, %11 : vector<16x128xf32>
    %cst_7 = arith.constant dense<0.000000e+00> : vector<128xf32>
    %13 = vector.multi_reduction <add>, %12, %cst_7 [0] : vector<16x128xf32> to vector<128xf32>
    %14 = vector.shape_cast %13 : vector<128xf32> to vector<1x128xf32>
    %cst_8 = arith.constant 1.600000e+01 : f32
    %15 = vector.broadcast %cst_8 : f32 to vector<1x128xf32>
    %16 = arith.divf %14, %15 : vector<1x128xf32>
    %17 = arith.mulf %12, %12 : vector<16x128xf32>
    %cst_9 = arith.constant dense<0.000000e+00> : vector<128xf32>
    %18 = vector.multi_reduction <add>, %17, %cst_9 [0] : vector<16x128xf32> to vector<128xf32>
    %19 = vector.shape_cast %18 : vector<128xf32> to vector<1x128xf32>
    %cst_10 = arith.constant 1.600000e+01 : f32
    %20 = vector.broadcast %cst_10 : f32 to vector<1x128xf32>
    %21 = arith.divf %19, %20 : vector<1x128xf32>
    %22 = arith.mulf %16, %16 : vector<1x128xf32>
    %23 = arith.subf %21, %22 : vector<1x128xf32>
    %cst_11 = arith.constant 0.000000e+00 : f32
    %24 = vector.broadcast %cst_11 : f32 to vector<1x128xf32>
    %25 = arith.maximumf %23, %24 : vector<1x128xf32>
    %cst_12 = arith.constant 9.99999996E-13 : f32
    %26 = vector.broadcast %cst_12 : f32 to vector<1x128xf32>
    %27 = arith.addf %25, %26 : vector<1x128xf32>
    %28 = math.rsqrt %27 : vector<1x128xf32>
    %29 = vector.broadcast %16 : vector<1x128xf32> to vector<16x128xf32>
    %30 = arith.subf %12, %29 : vector<16x128xf32>
    %31 = vector.broadcast %28 : vector<1x128xf32> to vector<16x128xf32>
    %32 = arith.mulf %30, %31 : vector<16x128xf32>
    %cst_13 = arith.constant 0.000000e+00 : f32
    %33 = vector.broadcast %cst_13 : f32 to vector<16x128xf32>
    %34 = arith.maximumf %32, %33 : vector<16x128xf32>
    %35 = arith.truncf %34 : vector<16x128xf32> to vector<16x128xbf16>
    %c0_14 = arith.constant 0 : index
    %c0_15 = arith.constant 0 : index
    %c0_16 = arith.constant 0 : index
    %36 = vector.load %arg3[%c0_14, %c0_15, %c0_16] : memref<1x128x128xbf16, #tpu.memory_space<vmem>>, vector<1x128x128xbf16>
    %37 = vector.shape_cast %36 : vector<1x128x128xbf16> to vector<128x128xbf16>
    %cst_17 = arith.constant dense<0.000000e+00> : vector<16x128xf32>
    %38 = tpu.matmul %35, %37, %cst_17 {dimension_numbers = #tpu.dot_dimension_numbers<[1], [0], [0], [1], [0, 0, 1, 1], [], []>} : vector<16x128xbf16>, vector<128x128xbf16>, vector<16x128xf32> -> vector<16x128xf32>
    %c0_18 = arith.constant 0 : index
    %c0_19 = arith.constant 0 : index
    %c0_20 = arith.constant 0 : index
    %39 = vector.load %arg4[%c0_18, %c0_19, %c0_20] : memref<1x1x128xf32, #tpu.memory_space<vmem>>, vector<1x1x128xf32>
    %40 = vector.shape_cast %39 : vector<1x1x128xf32> to vector<1x128xf32>
    %41 = vector.broadcast %40 : vector<1x128xf32> to vector<16x128xf32>
    %42 = arith.addf %38, %41 : vector<16x128xf32>
    %cst_21 = arith.constant dense<0.000000e+00> : vector<128xf32>
    %43 = vector.multi_reduction <add>, %42, %cst_21 [0] : vector<16x128xf32> to vector<128xf32>
    %44 = vector.shape_cast %43 : vector<128xf32> to vector<1x128xf32>
    %cst_22 = arith.constant 1.600000e+01 : f32
    %45 = vector.broadcast %cst_22 : f32 to vector<1x128xf32>
    %46 = arith.divf %44, %45 : vector<1x128xf32>
    %47 = arith.mulf %42, %42 : vector<16x128xf32>
    %cst_23 = arith.constant dense<0.000000e+00> : vector<128xf32>
    %48 = vector.multi_reduction <add>, %47, %cst_23 [0] : vector<16x128xf32> to vector<128xf32>
    %49 = vector.shape_cast %48 : vector<128xf32> to vector<1x128xf32>
    %cst_24 = arith.constant 1.600000e+01 : f32
    %50 = vector.broadcast %cst_24 : f32 to vector<1x128xf32>
    %51 = arith.divf %49, %50 : vector<1x128xf32>
    %52 = arith.mulf %46, %46 : vector<1x128xf32>
    %53 = arith.subf %51, %52 : vector<1x128xf32>
    %cst_25 = arith.constant 0.000000e+00 : f32
    %54 = vector.broadcast %cst_25 : f32 to vector<1x128xf32>
    %55 = arith.maximumf %53, %54 : vector<1x128xf32>
    %cst_26 = arith.constant 9.99999996E-13 : f32
    %56 = vector.broadcast %cst_26 : f32 to vector<1x128xf32>
    %57 = arith.addf %55, %56 : vector<1x128xf32>
    %58 = math.rsqrt %57 : vector<1x128xf32>
    %59 = vector.broadcast %46 : vector<1x128xf32> to vector<16x128xf32>
    %60 = arith.subf %42, %59 : vector<16x128xf32>
    %61 = vector.broadcast %58 : vector<1x128xf32> to vector<16x128xf32>
    %62 = arith.mulf %60, %61 : vector<16x128xf32>
    %cst_27 = arith.constant 0.000000e+00 : f32
    %63 = vector.broadcast %cst_27 : f32 to vector<16x128xf32>
    %64 = arith.maximumf %62, %63 : vector<16x128xf32>
    %c0_28 = arith.constant 0 : index
    %c0_29 = arith.constant 0 : index
    %c0_30 = arith.constant 0 : index
    %65 = vector.load %arg5[%c0_28, %c0_29, %c0_30] : memref<1x2x128xf32, #tpu.memory_space<vmem>>, vector<1x2x128xf32>
    %66 = vector.shape_cast %65 : vector<1x2x128xf32> to vector<2x128xf32>
    %c0_31 = arith.constant 0 : index
    %c0_32 = arith.constant 0 : index
    %c0_33 = arith.constant 0 : index
    %67 = vector.load %arg6[%c0_31, %c0_32, %c0_33] : memref<1x1x2xf32, #tpu.memory_space<vmem>>, vector<1x1x2xf32>
    %68 = vector.shape_cast %67 : vector<1x1x2xf32> to vector<1x2xf32>
    %69 = vector.extract_strided_slice %66 {offsets = [0, 0], sizes = [1, 128], strides = [1, 1]} : vector<2x128xf32> to vector<1x128xf32>
    %70 = vector.broadcast %69 : vector<1x128xf32> to vector<16x128xf32>
    %71 = arith.mulf %64, %70 : vector<16x128xf32>
    %cst_34 = arith.constant dense<0.000000e+00> : vector<16xf32>
    %72 = vector.multi_reduction <add>, %71, %cst_34 [1] : vector<16x128xf32> to vector<16xf32>
    %73 = vector.shape_cast %72 : vector<16xf32> to vector<16x1xf32>
    %74 = vector.extract_strided_slice %68 {offsets = [0, 0], sizes = [1, 1], strides = [1, 1]} : vector<1x2xf32> to vector<1x1xf32>
    %75 = vector.broadcast %74 : vector<1x1xf32> to vector<16x1xf32>
    %76 = arith.addf %73, %75 : vector<16x1xf32>
    %77 = vector.extract_strided_slice %66 {offsets = [1, 0], sizes = [1, 128], strides = [1, 1]} : vector<2x128xf32> to vector<1x128xf32>
    %78 = vector.broadcast %77 : vector<1x128xf32> to vector<16x128xf32>
    %79 = arith.mulf %64, %78 : vector<16x128xf32>
    %cst_35 = arith.constant dense<0.000000e+00> : vector<16xf32>
    %80 = vector.multi_reduction <add>, %79, %cst_35 [1] : vector<16x128xf32> to vector<16xf32>
    %81 = vector.shape_cast %80 : vector<16xf32> to vector<16x1xf32>
    %82 = vector.extract_strided_slice %68 {offsets = [0, 1], sizes = [1, 1], strides = [1, 1]} : vector<1x2xf32> to vector<1x1xf32>
    %83 = vector.broadcast %82 : vector<1x1xf32> to vector<16x1xf32>
    %84 = arith.addf %81, %83 : vector<16x1xf32>
    %85 = arith.negf %84 : vector<16x1xf32>
    %86 = math.exp %85 : vector<16x1xf32>
    %cst_36 = arith.constant 1.000000e+00 : f32
    %87 = vector.broadcast %cst_36 : f32 to vector<16x1xf32>
    %88 = arith.addf %87, %86 : vector<16x1xf32>
    %89 = arith.divf %87, %88 : vector<16x1xf32>
    %90 = arith.mulf %89, %1 : vector<16x1xf32>
    %91 = arith.addf %90, %76 : vector<16x1xf32>
    %92 = math.log %89 : vector<16x1xf32>
    %93 = arith.addf %3, %92 : vector<16x1xf32>
    %c0_37 = arith.constant 0 : index
    %c0_38 = arith.constant 0 : index
    %94 = vector.load %arg7[%c0_37, %c0_38] : memref<16x2xf32, #tpu.memory_space<vmem>>, vector<16x1xf32>
    tpu.vector_store %arg7[%c0_37, %c0_38], %91 {strides = array<i32>} : memref<16x2xf32, #tpu.memory_space<vmem>>, vector<16x1xf32>,
    %c0_39 = arith.constant 0 : index
    %c1 = arith.constant 1 : index
    %95 = vector.load %arg7[%c0_39, %c1] : memref<16x2xf32, #tpu.memory_space<vmem>>, vector<16x1xf32>
    tpu.vector_store %arg7[%c0_39, %c1], %2 {strides = array<i32>} : memref<16x2xf32, #tpu.memory_space<vmem>>, vector<16x1xf32>,
    %c0_40 = arith.constant 0 : index
    %c0_41 = arith.constant 0 : index
    %96 = vector.load %arg8[%c0_40, %c0_41] : memref<16x1xf32, #tpu.memory_space<vmem>>, vector<16x1xf32>
    tpu.vector_store %arg8[%c0_40, %c0_41], %93 {strides = array<i32>} : memref<16x1xf32, #tpu.memory_space<vmem>>, vector<16x1xf32>,
    return
  }
}

</mosaic_0001>

<bundles_post_ra>
// kernel: tpu_custom_call.1
= control target key start
LH: loop header
LB: loop body
LE: loop exit
PB: predicated region body
PF: predicated region fallthrough
CT: control target
= control target key end

     0   :  { %14 = vsyncpa [#allocation3], 0  ;;  %s444_s27 = smov [#allocation2]   ;;  %s549_s0 = inlined_call_operand.vmem [shape: f32[16,2], index: 0, kind: input, shape index: {}]   ;;  %s550_s1 = inlined_call_operand.vmem [shape: f32[1,1,128], index: 1, kind: input, shape index: {}]   ;;  %s551_s2 = inlined_call_operand.vmem [shape: f32[1,1,128], index: 2, kind: input, shape index: {}]   ;;  %s552_s3 = inlined_call_operand.hbm [shape: bf16[1,128,128], index: 3, kind: input, shape index: {}]   ;;  %s553_s4 = inlined_call_operand.vmem [shape: f32[1,1,128], index: 4, kind: input, shape index: {}]   ;;  %s554_s5 = inlined_call_operand.vmem [shape: f32[1,2,128], index: 5, kind: input, shape index: {}]   ;;  %s555_s6 = inlined_call_operand.vmem [shape: f32[1,1,2], index: 6, kind: input, shape index: {}]   ;;  %s556_s7 = inlined_call_operand.vmem [shape: f32[16,2], index: 7, kind: output, shape index: {0}]   ;;  %s557_s8 = inlined_call_operand.vmem [shape: f32[16,1], index: 8, kind: output, shape index: {1}]  }
   0x1   :  { %s26_s28 = sshll.u32 %s444_s27, 4  ;;  %s27_s28 = int_to_ptr.vmem [resolvable:$true] %s26_s28 }
   0x2   :  { %s430_s29 = scalar_lea.vmem %s27_s28, 1024  ;;  %p435_p1 = scmp.lt.s32.totalorder %s27_s28, %s27_s28 }
   0x3   :  { %p431_p0 = scmp.ne.s32.totalorder %s27_s28, %s430_s29  ;;  %p436_p2 = scmp.lt.s32.totalorder %s430_s29, %s430_s29 }
   0x5   :  { %p437_p3 = por %p436_p2, %p435_p1 }
   0x7   :  { %p438_p4 = pnand %p437_p3, %p431_p0 }
   0x9   :  { %441 = shalt.err (!%p438_p4)
}
   0xa   :  { %s445_s30 = smov 64   ;;  %s446_s9 = smov 4  }
   0xb   :  { %32 = dma.hbm_to_vmem [thread:$0]  %s552_s3, 1024, %s27_s28, [#allocation3], %s445_s30, %s445_s30, %s446_s9  }
   0xc   :  { %442 = dma.done.wait [#allocation3], 1024  }
   0xd   :  { %443 = vsyncadd [#allocation3], 4294966272  ;;  %v447_v0 = vmov 1   ;;  %v503_v1 = vld [vmem:[%s549_s0] sm:$0xff]  ;;  %v509_v2 = vld [vmem:[%s549_s0 + $0x8] sm:$0xff]  ;;  %v448_v4 = vmov 0.0  }
   0xe   :  { %397 = vset.pattern.permute.xlu0 %v447_v0  ;;  %v398_v3 = vld [vmem:[#allocation2 + $0x38] sm:$0xff]   ;;  %369 = vmatprep.subr.bf16.mxu0 %v448_v4  ;;  %v399_v5 = vld [vmem:[#allocation2 + $0x30] sm:$0xff]   ;;  %v400_v6 = vld [vmem:[#allocation2 + $0x28] sm:$0xff]   ;;  %vm449_vm0 = vmmov 0   ;;  %s450_s19 = smov 1   ;;  %s451_s21 = smov 127  }
   0xf   :  { %48 = vperm.xlu0 %397, %v503_v1   ;;  %370 = vmatpush3.bf16.msra.mxu0 %v398_v3  ;;  %v401_v7 = vld [vmem:[#allocation2 + $0x20] sm:$0xff]   ;;  %v402_v8 = vld [vmem:[#allocation2 + $0x18] sm:$0xff]   ;;  %v403_v9 = vld [vmem:[#allocation2 + $0x10] sm:$0xff]   ;;  %vm321_vm1 = vcmask 7168   ;;  %vm324_vm2 = vcmask 15368  }
  0x10   :  { %371 = vmatprep.subr.bf16.mxu0 %v448_v4  ;;  %385 = vmatprep.mubr.msk.bf16.mxu0 %vm449_vm0, %v448_v4  ;;  %v404_v10 = vld [vmem:[#allocation2 + $0x8] sm:$0xff]   ;;  %v405_v11 = vld [vmem:[#allocation2] sm:$0xff]  }
  0x11   :  { %v346_v12 = vld [vmem:[%s550_s1] ss:$0 sm:$0xff] }
  0x12   :  { %v347_v15 = vld [vmem:[%s551_s2] ss:$0 sm:$0xff] }
  0x13   :  { %53 = vperm.xlu0 %397, %v509_v2   ;;  %372 = vmatpush3.bf16.msra.mxu0 %v399_v5  ;;  %v348_v50 = vld [vmem:[%s553_s4] ss:$0 sm:$0xff] }
  0x14   :  { %373 = vmatprep.subr.bf16.mxu0 %v448_v4 }
  0x17   :  { %374 = vmatpush3.bf16.msra.mxu0 %v400_v6 }
  0x18   :  { %375 = vmatprep.subr.bf16.mxu0 %v448_v4 }
  0x1b   :  { %376 = vmatpush3.bf16.msra.mxu0 %v401_v7 }
  0x1c   :  { %377 = vmatprep.subr.bf16.mxu0 %v448_v4 }
  0x1f   :  { %378 = vmatpush3.bf16.msra.mxu0 %v402_v8 }
  0x20   :  { %379 = vmatprep.subr.bf16.mxu0 %v448_v4 }
  0x23   :  { %380 = vmatpush3.bf16.msra.mxu0 %v403_v9 }
  0x24   :  { %381 = vmatprep.subr.bf16.mxu0 %v448_v4 }
  0x27   :  { %382 = vmatpush3.bf16.msra.mxu0 %v404_v10 }
  0x28   :  { %383 = vmatprep.subr.bf16.mxu0 %v448_v4 }
  0x2b   :  { %384 = vmatpush3.bf16.msra.mxu0 %v405_v11 }
  0x8a   :  { %v49_v13 = vpop.permute.xlu0 %48 }
  0x8b   :  { %v62_v14 = vmul.f32 %v346_v12, %v49_v13 }
  0x8d   :  { %v71_v17 = vadd.f32 %v347_v15, %v62_v14 }
  0x8e   :  { %v54_v16 = vpop.permute.xlu0 %53 }
  0x8f   :  { %v63_v18 = vmul.f32 %v346_v12, %v54_v16  ;;  %v82_v20 = vmul.f32 %v71_v17, %v71_v17 }
  0x91   :  { %v72_v19 = vadd.f32 %v347_v15, %v63_v18 }
  0x93   :  { %v73_v21 = vadd.f32 %v72_v19, %v71_v17  ;;  %v83_v22 = vmul.f32 %v72_v19, %v72_v19 }
  0x95   :  { %v74_v23 = vrot.slane %v73_v21, 4  ;;  %v84_v24 = vadd.f32 %v83_v22, %v82_v20 }
  0x97   :  { %v75_v25 = vadd.f32 %v74_v23, %v73_v21  ;;  %v85_v26 = vrot.slane %v84_v24, 4  ;;  %v245_v21 = vld [vmem:[%s554_s5] sm:$0x3] }
  0x99   :  { %v76_v27 = vrot.slane %v75_v25, 2  ;;  %v86_v28 = vadd.f32 %v85_v26, %v84_v24 }
  0x9b   :  { %v77_v29 = vadd.f32 %v76_v27, %v75_v25  ;;  %v87_v30 = vrot.slane %v86_v28, 2 }
  0x9d   :  { %v78_v31 = vrot.slane %v77_v29, 1  ;;  %v88_v32 = vadd.f32 %v87_v30, %v86_v28 }
  0x9f   :  { %v79_v33 = vadd.f32 %v78_v31, %v77_v29  ;;  %v89_v34 = vrot.slane %v88_v32, 1 }
  0xa1   :  { %v81_v35 = vmul.f32 0.0625, %v79_v33  ;;  %v90_v36 = vadd.f32 %v89_v34, %v88_v32 }
  0xa3   :  { %v91_v37 = vmul.f32 0.0625, %v90_v36  ;;  %v92_v38 = vmul.f32 %v81_v35, %v81_v35  ;;  %v98_v42 = vsub.f32 %v72_v19, %v81_v35  ;;  %v97_v43 = vsub.f32 %v71_v17, %v81_v35  ;;  %v357_v35 = vld [vmem:[%s555_s6] ss:$0 sm:$0xff] }
  0xa4   :  { %v247_v17 = vlaneseq }
  0xa5   :  { %v93_v39 = vsub.f32 %v91_v37, %v92_v38 }
  0xa6   :  { %v248_v18 = vshrl.u32 %v247_v17, 7 }
  0xa7   :  { %v94_v40 = vmax.f32 %v93_v39, 0.0 }
  0xa8   :  { %v267_v19 = vsub.s32 1, %v248_v18  ;;  %v249_v20 = vsub.s32 0, %v248_v18 }
  0xa9   :  { %v95_v41 = vadd.f32 1e-12, %v94_v40 }
  0xaa   :  { %v268_v26 = vrot.slane %v245_v21, %v267_v19  ;;  %v250_v27 = vrot.slane %v245_v21, %v249_v20 }
  0xab   :  { %406 = vrsqrt.f32 %v95_v41 }
  0xb8   :  { %v407_v44 = vpop.eup %406 }
  0xb9   :  { %v99_v45 = vmul.f32 %v407_v44, %v97_v43  ;;  %v100_v46 = vmul.f32 %v407_v44, %v98_v42 }
  0xbb   :  { %v101_v47 = vmax.f32 %v99_v45, 0.0  ;;  %v102_v48 = vmax.f32 %v100_v46, 0.0 }
  0xbd   :  { %v103_v49 = vpack.c.bf16 %v102_v48, %v101_v47 }
  0xbf   :  { %386 = vmatmul.mubr.bf16.vlgmr.msra.gmra.mxu0 %v103_v49 }
 0x17f   :  { %v209_v51 = vpop.f32.mrf.mxu0 }
 0x180   :  { %v210_v53 = vadd.f32 %v348_v50, %v209_v51 }
 0x181   :  { %v387_v52 = vpop.f32.mrf.mxu0 }
 0x182   :  { %v224_v57 = vmul.f32 %v210_v53, %v210_v53 }
 0x183   :  { %v212_v54 = vpop.f32.mrf.mxu0 }
 0x184   :  { %v213_v55 = vadd.f32 %v348_v50, %v212_v54 }
 0x185   :  { %v388_v56 = vpop.f32.mrf.mxu0 }
 0x186   :  { %v216_v58 = vadd.f32 %v213_v55, %v210_v53  ;;  %v225_v59 = vmul.f32 %v213_v55, %v213_v55 }
 0x188   :  { %v217_v60 = vrot.slane %v216_v58, 4  ;;  %v226_v61 = vadd.f32 %v225_v59, %v224_v57 }
 0x18a   :  { %v218_v62 = vadd.f32 %v217_v60, %v216_v58  ;;  %v227_v63 = vrot.slane %v226_v61, 4 }
 0x18c   :  { %v219_v0 = vrot.slane %v218_v62, 2  ;;  %v228_v3 = vadd.f32 %v227_v63, %v226_v61 }
 0x18e   :  { %v220_v4 = vadd.f32 %v219_v0, %v218_v62  ;;  %v229_v5 = vrot.slane %v228_v3, 2 }
 0x190   :  { %v221_v6 = vrot.slane %v220_v4, 1  ;;  %v230_v7 = vadd.f32 %v229_v5, %v228_v3 }
 0x192   :  { %v222_v8 = vadd.f32 %v221_v6, %v220_v4  ;;  %v231_v9 = vrot.slane %v230_v7, 1 }
 0x194   :  { %v223_v10 = vmul.f32 0.0625, %v222_v8  ;;  %v232_v11 = vadd.f32 %v231_v9, %v230_v7 }
 0x196   :  { %v233_v12 = vmul.f32 0.0625, %v232_v11  ;;  %v234_v13 = vmul.f32 %v223_v10, %v223_v10  ;;  %v240_v22 = vsub.f32 %v213_v55, %v223_v10  ;;  %v239_v23 = vsub.f32 %v210_v53, %v223_v10 }
 0x198   :  { %v235_v14 = vsub.f32 %v233_v12, %v234_v13 }
 0x19a   :  { %v236_v15 = vmax.f32 %v235_v14, 0.0 }
 0x19c   :  { %v237_v16 = vadd.f32 1e-12, %v236_v15 }
 0x19e   :  { %408 = vrsqrt.f32 %v237_v16 }
 0x1ab   :  { %v409_v24 = vpop.eup %408 }
 0x1ac   :  { %v241_v25 = vmul.f32 %v409_v24, %v239_v23  ;;  %v242_v28 = vmul.f32 %v409_v24, %v240_v22 }
 0x1ae   :  { %v243_v29 = vmax.f32 %v241_v25, 0.0  ;;  %v244_v32 = vmax.f32 %v242_v28, 0.0 }
 0x1b0   :  { %v269_v30 = vmul.f32 %v268_v26, %v243_v29  ;;  %v251_v31 = vmul.f32 %v250_v27, %v243_v29  ;;  %v252_v33 = vmul.f32 %v250_v27, %v244_v32  ;;  %v270_v34 = vmul.f32 %v268_v26, %v244_v32 }
 0x1b2   :  { %271 = vadd.xlane.f32.xlu0 %v269_v30  ;;  %253 = vadd.xlane.f32.xlu1 %v251_v31 }
 0x1b6   :  { %255 = vadd.xlane.f32.xlu1 %v252_v33 }
 0x1ba   :  { %273 = vadd.xlane.f32.xlu1 %v270_v34 }
 0x1cb   :  { %289 = vrot.lane.b32.xlu1 %v503_v1, %s450_s19 }
 0x1cf   :  { %291 = vrot.lane.b32.xlu1 %v509_v2, %s450_s19 }
 0x23b   :  { %v272_v36 = vpop.xlane.xlu0 %271  ;;  %v254_v37 = vpop.xlane.xlu1 %253 }
 0x23c   :  { %v275_v38 = vadd.f32 %v357_v35, %v272_v36  ;;  %v263_v39 = vadd.f32 %v357_v35, %v254_v37 }
 0x23e   :  { %v358_v40 = vmul.f32 -1.442695, %v275_v38  ;;  %299 = vrot.lane.b32.xlu1 %v263_v39, %s450_s19 }
 0x23f   :  { %v256_v41 = vpop.xlane.xlu1 %255 }
 0x240   :  { %410 = vpow2.f32 %v358_v40  ;;  %v264_v42 = vadd.f32 %v357_v35, %v256_v41 }
 0x242   :  { %301 = vrot.lane.b32.xlu1 %v264_v42, %s450_s19 }
 0x243   :  { %v274_v48 = vpop.xlane.xlu1 %273 }
 0x244   :  { %v276_v49 = vadd.f32 %v357_v35, %v274_v48 }
 0x246   :  { %v359_v50 = vmul.f32 -1.442695, %v276_v49 }
 0x247   :  { %v290_v54 = vpop.permute.xlu1 %289 }
 0x24b   :  { %v292_v55 = vpop.permute.xlu1 %291 }
 0x24d   :  { %v411_v43 = vpop.eup %410 }
 0x24e   :  { %v283_v44 = vadd.f32 1.0, %v411_v43 }
 0x250   :  { %412 = vrcp.f32 %v283_v44 }
 0x25d   :  { %v413_v45 = vpop.eup %412 }
 0x25e   :  { %414 = vlog2.f32 %v413_v45  ;;  %v295_v56 = vmul.f32 %v413_v45, %v290_v54 }
 0x25f   :  { %416 = vpow2.f32 %v359_v50 }
 0x26b   :  { %v415_v46 = vpop.eup %414 }
 0x26c   :  { %v308_v47 = vmul.f32 0.6931472, %v415_v46  ;;  %v417_v51 = vpop.eup %416 }
 0x26d   :  { %v284_v52 = vadd.f32 1.0, %v417_v51 }
 0x26e   :  { %329 = vrot.lane.b32.xlu1 %v308_v47, %s451_s21 }
 0x26f   :  { %418 = vrcp.f32 %v284_v52 }
 0x27c   :  { %v419_v53 = vpop.eup %418 }
 0x27d   :  { %420 = vlog2.f32 %v419_v53  ;;  %v296_v59 = vmul.f32 %v419_v53, %v292_v55 }
 0x28a   :  { %v421_v62 = vpop.eup %420 }
 0x28b   :  { %v310_v63 = vmul.f32 0.6931472, %v421_v62 }
 0x2b0   :  { %v300_v57 = vpop.permute.xlu1 %299 }
 0x2b1   :  { %v305_v58 = vadd.f32 %v300_v57, %v295_v56 }
 0x2b3   :  { %315 = vrot.lane.b32.xlu0 %v305_v58, %s451_s21 }
 0x2b4   :  { %v302_v60 = vpop.permute.xlu1 %301 }
 0x2b5   :  { %v306_v61 = vadd.f32 %v302_v60, %v296_v59 }
 0x2b7   :  { %317 = vrot.lane.b32.xlu1 %v306_v61, %s451_s21 }
 0x2bb   :  { %331 = vrot.lane.b32.xlu1 %v310_v63, %s451_s21 }
 0x2e0   :  { %v330_v0 = vpop.permute.xlu1 %329 }
 0x2e1   :  { %335 = vst.msk [vmem:[%s557_s8] sm:$0xff] %vm321_vm1, %v330_v0 }
 0x325   :  { %v316_v3 = vpop.permute.xlu0 %315 }
 0x326   :  { %322 = vst.msk [vmem:[%s556_s7] sm:$0xff] %vm321_vm1, %v316_v3 }
 0x327   :  { %325 = vst.msk [vmem:[%s556_s7] sm:$0xff] %vm324_vm2, %v503_v1 }
 0x329   :  { %v318_v4 = vpop.permute.xlu1 %317 }
 0x32a   :  { %323 = vst.msk [vmem:[%s556_s7 + $0x8] sm:$0xff] %vm321_vm1, %v318_v4 }
 0x32b   :  { %326 = vst.msk [vmem:[%s556_s7 + $0x8] sm:$0xff] %vm324_vm2, %v509_v2 }
 0x32d   :  { %v332_v5 = vpop.permute.xlu1 %331 }
 0x32e   :  { %336 = vst.msk [vmem:[%s557_s8 + $0x8] sm:$0xff] %vm321_vm1, %v332_v5 }
 0x32f   :  { %345 = vsyncpa [#allocation3], 1 }

</bundles_post_ra>
